<compile_context>
chip_gen: v7x
topology: tpu7x:2x2x1
jax: 0.10.0
libtpu: 0.0.40
codegen_flags: <defaults>
</compile_context>

<pallas_src>
import math
from functools import partial

import jax
import jax.numpy as jnp
from jax import lax
from jax.experimental import pallas as pl
from jax.experimental.pallas import tpu as pltpu


# ---------------------------------------------------------------------------
# helpers: tile-size selection (must divide evenly; fall back to full extent)
# ---------------------------------------------------------------------------
def _pick_tile(dim, candidates):
    for c in candidates:
        if dim >= c and dim % c == 0:
            return c
    return dim


def _head_group(num_heads, head_dim):
    """Smallest head group whose width is a lane-dense multiple of 128."""
    for g in range(1, num_heads + 1):
        if num_heads % g == 0 and (g * head_dim) % 128 == 0:
            return g
    return num_heads  # fall back to all heads (block == full hidden dim)


# ---------------------------------------------------------------------------
# Kernel 1: batched tiled linear  out[p] = x @ W[p] + b[p]
#   x: (M, K), w: (P, K, N), b: (P, 1, N) -> out: (P, M, N)
#   grid = (P, M//tm, N//tn, K//tk), f32 accumulator scratch
# ---------------------------------------------------------------------------
def _matmul_bias_kernel(x_ref, w_ref, b_ref, o_ref, acc_ref):
    @pl.when(pl.program_id(3) == 0)
    def _():
        acc_ref[...] = jnp.zeros_like(acc_ref)

    acc_ref[...] += jnp.dot(
        x_ref[...], w_ref[0], preferred_element_type=jnp.float32
    )

    @pl.when(pl.program_id(3) == pl.num_programs(3) - 1)
    def _():
        o_ref[0] = (acc_ref[...] + b_ref[0]).astype(o_ref.dtype)


def batched_linear_pallas(x, w, b):
    """x: (M, K), w: (P, K, N), b: (P, N) -> (P, M, N)."""
    M, K = x.shape
    P, K2, N = w.shape
    assert K == K2 and b.shape == (P, N)

    tm = _pick_tile(M, (256, 128, 64, 32, 16, 8))
    tn = _pick_tile(N, (512, 256, 128))
    tk = _pick_tile(K, (512, 256, 128))
    grid = (P, M // tm, N // tn, K // tk)

    return pl.pallas_call(
        _matmul_bias_kernel,
        out_shape=jax.ShapeDtypeStruct((P, M, N), x.dtype),
        grid=grid,
        in_specs=[
            pl.BlockSpec((tm, tk), lambda p, i, j, k: (i, k)),
            pl.BlockSpec((1, tk, tn), lambda p, i, j, k: (p, k, j)),
            pl.BlockSpec((1, 1, tn), lambda p, i, j, k: (p, 0, j)),
        ],
        out_specs=pl.BlockSpec((1, tm, tn), lambda p, i, j, k: (p, i, j)),
        scratch_shapes=[pltpu.VMEM((tm, tn), jnp.float32)],
        compiler_params=pltpu.CompilerParams(
            dimension_semantics=("parallel", "parallel", "parallel", "arbitrary"),
            vmem_limit_bytes=64 * 1024 * 1024,
        ),
    )(x, w, b.reshape(P, 1, N))


# ---------------------------------------------------------------------------
# Kernel 2: full attention. One grid step = (batch, head-group).
#   q/k/v blocks: (1, 1, S, hg*D) views into the fused (3, B, S, hidden) qkv
#   bias block  : (1, hg, S, S)          (only in the bias variant)
#   out block   : (1, S, hg*D)           (lane-dense writeback)
# ---------------------------------------------------------------------------
def _attn_body(q_ref, k_ref, v_ref, bias_ref, o_ref, heads_per_block, head_dim):
    # TODO(synk): for very large S, switch to a KV-tiled online-softmax (flash)
    # variant to bound VMEM independent of S.
    for h in range(heads_per_block):  # static unrolled loop over heads
        lo, hi = h * head_dim, (h + 1) * head_dim
        q = q_ref[0, 0, :, lo:hi]  # (S, D) -- sqrt(D) scale already folded into W_q
        k = k_ref[0, 0, :, lo:hi]  # (S, D)
        v = v_ref[0, 0, :, lo:hi]  # (S, D)

        # scores = q @ k^T (+ bias): contract on last dims, no explicit transpose
        s = lax.dot_general(
            q, k, (((1,), (1,)), ((), ())), preferred_element_type=jnp.float32
        )
        if bias_ref is not None:
            s = s + bias_ref[0, h]

        # numerically stable softmax over the last axis
        m = jnp.max(s, axis=-1, keepdims=True)
        e = jnp.exp(s - m)
        p = e * pl.reciprocal(jnp.sum(e, axis=-1, keepdims=True), approx=True)

        # TODO(synk): attention dropout (nn.Dropout) omitted — eval-mode identity.

        o = jnp.dot(p.astype(v.dtype), v, preferred_element_type=jnp.float32)
        o_ref[0, :, lo:hi] = o.astype(o_ref.dtype)


def _attn_kernel_bias(q_ref, k_ref, v_ref, b_ref, o_ref, *, heads_per_block, head_dim):
    _attn_body(q_ref, k_ref, v_ref, b_ref, o_ref, heads_per_block, head_dim)


def _attn_kernel_nobias(q_ref, k_ref, v_ref, o_ref, *, heads_per_block, head_dim):
    _attn_body(q_ref, k_ref, v_ref, None, o_ref, heads_per_block, head_dim)


def fused_attention_pallas(qkv, attn_bias, num_heads):
    """qkv: (3, B, S, hidden); attn_bias: (B, H, S, S) or None -> (B, S, hidden)."""
    _, B, S, hidden = qkv.shape
    assert hidden % num_heads == 0
    D = hidden // num_heads
    hg = _head_group(num_heads, D)
    HB = num_heads // hg

    def qkv_spec(which):
        return pl.BlockSpec(
            (1, 1, S, hg * D), lambda b, hb, w=which: (w, b, 0, hb)
        )

    in_specs = [qkv_spec(0), qkv_spec(1), qkv_spec(2)]
    operands = [qkv, qkv, qkv]  # same array, three different projection views

    if attn_bias is not None:
        in_specs.append(pl.BlockSpec((1, hg, S, S), lambda b, hb: (b, hb, 0, 0)))
        operands.append(attn_bias)
        kern = partial(_attn_kernel_bias, heads_per_block=hg, head_dim=D)
    else:
        kern = partial(_attn_kernel_nobias, heads_per_block=hg, head_dim=D)

    return pl.pallas_call(
        kern,
        out_shape=jax.ShapeDtypeStruct((B, S, hidden), qkv.dtype),
        grid=(B, HB),
        in_specs=in_specs,
        out_specs=pl.BlockSpec((1, S, hg * D), lambda b, hb: (b, 0, hb)),
        compiler_params=pltpu.CompilerParams(
            dimension_semantics=("parallel", "parallel"),
            vmem_limit_bytes=64 * 1024 * 1024,
        ),
    )(*operands)


# ---------------------------------------------------------------------------
# MultiHeadAttention wrapper (parameter setup + free reshapes in plain JAX)
# ---------------------------------------------------------------------------
class MultiHeadAttentionPallas:
    def __init__(self, hidden_size, attention_dropout_rate, num_heads, key):
        assert hidden_size % num_heads == 0
        self.hidden_size = hidden_size
        self.num_heads = num_heads
        self.att_size = hidden_size // num_heads
        # Reference: scale = sqrt(head_dim) and q is MULTIPLIED by it.
        self.scale = math.sqrt(self.att_size)
        self.attention_dropout_rate = attention_dropout_rate  # unused (eval mode)

        def init_linear(k, fan_in, fan_out):
            kw, kb = jax.random.split(k)
            bound = 1.0 / math.sqrt(fan_in)
            w = jax.random.uniform(kw, (fan_in, fan_out), jnp.float32, -bound, bound)
            b = jax.random.uniform(kb, (fan_out,), jnp.float32, -bound, bound)
            return w, b

        kq, kk, kv, ko = jax.random.split(key, 4)
        wq, bq = init_linear(kq, hidden_size, hidden_size)
        wk, bk = init_linear(kk, hidden_size, hidden_size)
        wv, bv = init_linear(kv, hidden_size, hidden_size)
        wo, bo = init_linear(ko, hidden_size, hidden_size)

        # Fold the reference's `q * sqrt(head_dim)` into the q projection.
        wq = wq * self.scale
        bq = bq * self.scale

        # Stack q/k/v into one fused projection operand.
        self.w_qkv = jnp.stack([wq, wk, wv])  # (3, hidden, hidden)
        self.b_qkv = jnp.stack([bq, bk, bv])  # (3, hidden)
        self.w_out = wo[None]                 # (1, hidden, hidden)
        self.b_out = bo[None]                 # (1, hidden)

    def __call__(self, x, attn_bias=None, mask=None):
        # TODO(synk): mask / sparse / flash attention paths of CoreAttention not implemented.
        B, S, Hd = x.shape

        x2d = x.reshape(B * S, Hd)
        qkv = batched_linear_pallas(x2d, self.w_qkv, self.b_qkv)  # (3, B*S, hidden)
        qkv = qkv.reshape(3, B, S, Hd)                            # free reshape

        o = fused_attention_pallas(qkv, attn_bias, self.num_heads)  # (B, S, hidden)

        out = batched_linear_pallas(o.reshape(B * S, Hd), self.w_out, self.b_out)
        out = out.reshape(B, S, Hd)                                # free reshape
        assert out.shape == x.shape
        return out


# ---------------------------------------------------------------------------
if __name__ == "__main__":
    batch, seq, hidden, heads = 2, 8, 32, 4
    key = jax.random.PRNGKey(0)
    kparam, kx, kb = jax.random.split(key, 3)

    mha = MultiHeadAttentionPallas(
        hidden_size=hidden, attention_dropout_rate=0.1, num_heads=heads, key=kparam
    )

    x = jax.random.normal(kx, (batch, seq, hidden), jnp.float32)
    attn_bias = 0.1 * jax.random.normal(kb, (batch, heads, seq, seq), jnp.float32)

    out = mha(x, attn_bias)
    out = jax.block_until_ready(out)
    assert out.shape == (batch, seq, hidden)

    # Also exercise the bias-free kernel variant (no zero bias materialized).
    out2 = jax.block_until_ready(mha(x, None))
    assert out2.shape == (batch, seq, hidden)

    print("KERNEL_OK")
</pallas_src>

<mosaic_0001>
module attributes {stable_mosaic.version = 11 : i64} {
  func.func @_matmul_bias_kernel(%arg0: i32, %arg1: i32, %arg2: i32, %arg3: i32, %arg4: memref<16x32xf32, #tpu.memory_space<vmem>>, %arg5: memref<1x32x32xf32, #tpu.memory_space<vmem>>, %arg6: memref<1x1x32xf32, #tpu.memory_space<vmem>>, %arg7: memref<1x16x32xf32, #tpu.memory_space<vmem>>, %arg8: memref<16x32xf32, #tpu.memory_space<vmem>>) attributes {dimension_semantics = [#tpu.dimension_semantics<parallel>, #tpu.dimension_semantics<parallel>, #tpu.dimension_semantics<parallel>, #tpu.dimension_semantics<arbitrary>], iteration_bounds = array<i64: 3, 1, 1, 1>, scalar_prefetch = 0 : i64, scratch_operands = 1 : i64, tpu.core_type = #tpu.core_type<tc>, window_params = [{transform_indices = @transform_0, window_bounds = array<i64: 16, 32>}, {transform_indices = @transform_1, window_bounds = array<i64: 1, 32, 32>}, {transform_indices = @transform_2, window_bounds = array<i64: 1, 1, 32>}, {transform_indices = @transform_3, window_bounds = array<i64: 1, 16, 32>}]} {
    %c0_i32 = arith.constant 0 : i32
    %0 = arith.cmpi eq, %arg3, %c0_i32 : i32
    %1 = arith.extui %0 : i1 to i32
    %c0_i32_0 = arith.constant 0 : i32
    %2 = arith.cmpi ne, %1, %c0_i32_0 : i32
    scf.if %2 {
      %cst_11 = arith.constant 0.000000e+00 : f32
      %13 = vector.broadcast %cst_11 : f32 to vector<16x32xf32>
      %c0_12 = arith.constant 0 : index
      %c0_13 = arith.constant 0 : index
      %14 = vector.load %arg8[%c0_12, %c0_13] : memref<16x32xf32, #tpu.memory_space<vmem>>, vector<16x32xf32>
      tpu.vector_store %arg8[%c0_12, %c0_13], %13 {strides = array<i32>} : memref<16x32xf32, #tpu.memory_space<vmem>>, vector<16x32xf32>,
    } else {
    }
    %c0 = arith.constant 0 : index
    %c0_1 = arith.constant 0 : index
    %3 = vector.load %arg8[%c0, %c0_1] : memref<16x32xf32, #tpu.memory_space<vmem>>, vector<16x32xf32>
    %c0_2 = arith.constant 0 : index
    %c0_3 = arith.constant 0 : index
    %4 = vector.load %arg4[%c0_2, %c0_3] : memref<16x32xf32, #tpu.memory_space<vmem>>, vector<16x32xf32>
    %c0_4 = arith.constant 0 : index
    %c0_5 = arith.constant 0 : index
    %c0_6 = arith.constant 0 : index
    %5 = vector.load %arg5[%c0_4, %c0_5, %c0_6] : memref<1x32x32xf32, #tpu.memory_space<vmem>>, vector<1x32x32xf32>
    %6 = vector.shape_cast %5 : vector<1x32x32xf32> to vector<32x32xf32>
    %cst = arith.constant dense<0.000000e+00> : vector<16x32xf32>
    %7 = tpu.matmul %4, %6, %cst {dimension_numbers = #tpu.dot_dimension_numbers<[1], [0], [0], [1], [0, 0, 1, 1], [], []>} : vector<16x32xf32>, vector<32x32xf32>, vector<16x32xf32> -> vector<16x32xf32>
    %8 = arith.addf %3, %7 : vector<16x32xf32>
    %c0_7 = arith.constant 0 : index
    %c0_8 = arith.constant 0 : index
    %9 = vector.load %arg8[%c0_7, %c0_8] : memref<16x32xf32, #tpu.memory_space<vmem>>, vector<16x32xf32>
    tpu.vector_store %arg8[%c0_7, %c0_8], %8 {strides = array<i32>} : memref<16x32xf32, #tpu.memory_space<vmem>>, vector<16x32xf32>,
    %c0_i32_9 = arith.constant 0 : i32
    %10 = arith.cmpi eq, %arg3, %c0_i32_9 : i32
    %11 = arith.extui %10 : i1 to i32
    %c0_i32_10 = arith.constant 0 : i32
    %12 = arith.cmpi ne, %11, %c0_i32_10 : i32
    scf.if %12 {
      %c0_11 = arith.constant 0 : index
      %c0_12 = arith.constant 0 : index
      %13 = vector.load %arg8[%c0_11, %c0_12] : memref<16x32xf32, #tpu.memory_space<vmem>>, vector<16x32xf32>
      %c0_13 = arith.constant 0 : index
      %c0_14 = arith.constant 0 : index
      %c0_15 = arith.constant 0 : index
      %14 = vector.load %arg6[%c0_13, %c0_14, %c0_15] : memref<1x1x32xf32, #tpu.memory_space<vmem>>, vector<1x1x32xf32>
      %15 = vector.shape_cast %14 : vector<1x1x32xf32> to vector<1x32xf32>
      %16 = vector.broadcast %15 : vector<1x32xf32> to vector<16x32xf32>
      %17 = arith.addf %13, %16 : vector<16x32xf32>
      %c0_16 = arith.constant 0 : index
      %c0_17 = arith.constant 0 : index
      %c0_18 = arith.constant 0 : index
      %18 = vector.load %arg7[%c0_16, %c0_17, %c0_18] : memref<1x16x32xf32, #tpu.memory_space<vmem>>, vector<1x16x32xf32>
      %19 = vector.shape_cast %18 : vector<1x16x32xf32> to vector<16x32xf32>
      %20 = vector.shape_cast %17 : vector<16x32xf32> to vector<1x16x32xf32>
      tpu.vector_store %arg7[%c0_16, %c0_17, %c0_18], %20 {strides = array<i32>} : memref<1x16x32xf32, #tpu.memory_space<vmem>>, vector<1x16x32xf32>,
    } else {
    }
    return
  }
  func.func @transform_0(%arg0: i32, %arg1: i32, %arg2: i32, %arg3: i32) -> (i32, i32) {
    %c0_i32 = arith.constant 0 : i32
    return %arg1, %arg3 : i32, i32
  }
  func.func @transform_1(%arg0: i32, %arg1: i32, %arg2: i32, %arg3: i32) -> (i32, i32, i32) {
    %c0_i32 = arith.constant 0 : i32
    return %arg0, %arg3, %arg2 : i32, i32, i32
  }
  func.func @transform_2(%arg0: i32, %arg1: i32, %arg2: i32, %arg3: i32) -> (i32, i32, i32) {
    %c0_i32 = arith.constant 0 : i32
    %c0_i32_0 = arith.constant 0 : i32
    return %arg0, %c0_i32, %arg2 : i32, i32, i32
  }
  func.func @transform_3(%arg0: i32, %arg1: i32, %arg2: i32, %arg3: i32) -> (i32, i32, i32) {
    %c0_i32 = arith.constant 0 : i32
    return %arg0, %arg1, %arg2 : i32, i32, i32
  }
}

</mosaic_0001>

<bundles_post_ra>
// kernel: tpu_custom_call.1
= control target key start
LH: loop header
LB: loop body
LE: loop exit
PB: predicated region body
PF: predicated region fallthrough
CT: control target
= control target key end

     0   :  { %s1159_s0 = inlined_call_operand.hbm [shape: f32[16,32], index: 0, kind: input, shape index: {}]   ;;  %s1160_s1 = inlined_call_operand.hbm [shape: f32[3,32,32], index: 1, kind: input, shape index: {}]   ;;  %s1161_s2 = inlined_call_operand.hbm [shape: f32[3,1,32], index: 2, kind: input, shape index: {}]   ;;  %s1162_s3 = inlined_call_operand.hbm [shape: f32[3,16,32], index: 3, kind: output, shape index: {}]  }
   0x1   :  { %1170 = sst [smem:[#allocation13_spill]] %s1160_s1 }
   0x2   :  { %8 = vsyncpa [#allocation4], 0 }
   0x3   :  { %9 = vsyncpa [#allocation7], 0 }
   0x4   :  { %11 = vsyncpa [#allocation7 + $0x1], 0 }
   0x5   :  { %12 = vsyncpa [#allocation5], 0 }
   0x6   :  { %14 = vsyncpa [#allocation5 + $0x1], 0  ;;  %s888_s12 = smov 0   ;;  %s890_s13 = smov 0  }
   0x7   :  { %s892_s14 = smov 0   ;;  %s894_s15 = smov 0  }
   0x8   :  { %s896_s16 = smov 0   ;;  %s898_s17 = smov 0  }
   0x9 LB: > { %s46_s18 = sadd.s32 1, %s853_s16  ;;  %s85_s19 = sadd.s32 1, %s845_s14  ;;  %s857_s17 = sphi %s898_s17, %s20_s17   ;;  %s853_s16 = sphi %s896_s16, %s1192_s16   ;;  %s849_s15 = sphi %s894_s15, %s1191_s15   ;;  %s845_s14 = sphi %s892_s14, %s1190_s14   ;;  %s841_s13 = sphi %s890_s13, %s1189_s13   ;;  %s837_s12 = sphi %s888_s12, %s1188_s12  }
   0xa   : > { %p48_p0 = scmp.ge.s32.totalorder %s46_s18, 3  ;;  %p92_p1 = scmp.ne.s32.totalorder %s845_s14, %s841_s13 }
   0xb   : > { %p93_p2 = scmp.eq.s32.totalorder %s857_s17, 0  ;;  %p626_p5 = scmp.lt.s32.totalorder %s857_s17, 3 }
   0xc   : > { %s1194_s18 = smov (%p48_p0, %s46_s18), 0  ;;  %s197_s22 = sand.u32 1, %s857_s17  }
   0xd   : > { %p928_p3 = por %p93_p2, %p92_p1  ;;  %s78_s21 = ssub.s32 %s853_s16, %s1194_s18 }
   0xe   : > { %p83_p4 = scmp.eq.s32.totalorder %s78_s21, 0  ;;  %s199_s23 = sand.u32 1, %s845_s14  }
   0xf   : > { %s557_s25 = sshll.u32 %s199_s23, 5  ;;  %s573_s26 = sshll.u32 %s853_s16, 9 }
  0x10   : > { %s938_s24 = scalar_select %p83_p4, %s845_s14, %s85_s19  }
  0x11   : > { %s1172_s1 = sld [smem:[#allocation13_spill]]  ;;  %s201_s30 = scalar_lea.vmem [#allocation6], %s557_s25 }
  0x12   : > { %s211_s4 = sshll.u32 %s201_s30, 4  ;;  %p952_p6 = pnand %p626_p5, %p928_p3  ;;  %s948_s4 = int_to_ptr.vmem [resolvable:$true] %s211_s4 }
  0x13   : > { %s956_s6 = scalar_lea.sflag [#allocation7], %s197_s22 }
  0x14   : > { %p685_p8 = pneg %p952_p6 }
  0x17   : > { %s946_s29 = scalar_lea.hbm %s1172_s1, %s573_s26  ;;  %s688_s10 = scalar_lea.hbm %s1172_s1, 1536 }
  0x18   : > { %s683_s7 = scalar_lea.hbm %s946_s29, 512  ;;  %p689_p11 = scmp.lt.u32.totalorder %s946_s29, %s1172_s1 }
  0x19   : > { %p684_p7 = scmp.ne.s32.totalorder %s946_s29, %s683_s7  ;;  %p690_p12 = scmp.lt.u32.totalorder %s688_s10, %s683_s7 }
  0x1a   : > { %p692_p0 = scmp.lt.u32.totalorder %s683_s7, %s946_s29 }
  0x1b   : > { %p686_p9 = pnand %p685_p8, %p684_p7  ;;  %p691_p13 = por %p690_p12, %p689_p11 }
  0x1d   : > { %p687_p10 = pneg %p686_p9  ;;  %p693_p2 = por %p692_p0, %p691_p13 }
  0x1f   : > { %p694_p3 = pnand %p693_p2, %p687_p10 }
  0x21   : > { %697 = shalt.err (!%p694_p3)
}
  0x22   : > { %s698_s20 = scalar_lea.vmem %s948_s4, 512  ;;  %s859_s21 = smov [#allocation6]  }
  0x23   : > { %p699_p4 = scmp.ne.s32.totalorder %s948_s4, %s698_s20  ;;  %s703_s22 = sshll.u32 %s859_s21, 4  ;;  %s704_s22 = int_to_ptr.vmem [resolvable:$false] %s703_s22 }
  0x24   : > { %s705_s25 = scalar_lea.vmem %s704_s22, 1024  ;;  %p706_p9 = scmp.lt.s32.totalorder %s948_s4, %s704_s22 }
  0x25   : > { %p701_p5 = pnand %p699_p4, %p685_p8  ;;  %p707_p11 = scmp.lt.s32.totalorder %s705_s25, %s698_s20 }
  0x27   : > { %p702_p7 = pneg %p701_p5  ;;  %p708_p12 = por %p707_p11, %p706_p9 }
  0x29   : > { %p709_p13 = pnand %p708_p12, %p702_p7 }
  0x2b   : > { %712 = shalt.err (!%p709_p13)
}
  0x2c   : > { %s1163_s26 = smov 128   ;;  %s1164_s27 = smov 8  }
  0x2d   : > { %617 = dma.hbm_to_vmem [thread:$0]  (!%p952_p6), %s946_s29, 512, %s948_s4, %s956_s6, %s1163_s26, %s1163_s26, %s1164_s27  }
  0x2e   : > { %s988_s28 = sadd.s32 4294967295, %s857_s17   ;;  %s553_s30 = sadd.s32 4294967294, %s857_s17  }
  0x2f   : > { %p98_p10 = scmp.ne.s32.totalorder %s841_s13, %s837_s12  ;;  %p1165_p0 = scmp.eq.s32.totalorder %s988_s28, 0 }
  0x30   : > { %p154_p2 = scmp.eq.s32.totalorder %s988_s28, 2  ;;  %p160_p3 = scmp.eq.s32.totalorder %s553_s30, 2 }
  0x31   : > { %p554_p4 = scmp.ge.s32.totalorder %s857_s17, 1  ;;  %p998_p5 = por %p1165_p0, %p98_p10 }
  0x32   : > { %p1005_p7 = por %p154_p2, %p92_p1  ;;  %p1009_p9 = por %p160_p3, %p98_p10 }
  0x33   : > { %s1174_s7 = scalar_select %p998_p5, 1, 0 }
  0x34   : > { %s1175_s29 = scalar_select %p1005_p7, 1, 0 }
  0x35   : > { %s1176_s4 = scalar_select %p1009_p9, 1, 0 }
  0x36   : > { %p167_p11 = scmp.lt.s32.totalorder %s857_s17, 4  ;;  %s862_s9 = smov [#allocation3]  }
  0x37   : > { %s183_s10 = sshll.u32 %s862_s9, 4  ;;  %s560_s11 = sshll.u32 %s853_s16, 4  ;;  %s1018_s10 = int_to_ptr.vmem [resolvable:$true] %s183_s10 }
  0x38   : > { %p1014_p12 = pnand %p554_p4, %p167_p11  ;;  %s1026_s21 = scalar_lea.hbm %s1161_s2, %s560_s11 }
  0x39   : > { %s224_s22 = scalar_lea.vmem [#allocation8], %s199_s23  ;;  %s713_s9 = scalar_lea.hbm %s1026_s21, 16 }
  0x3a   : > { %s1177_s8 = scalar_select %p1014_p12, 1, 0 }
  0x3b   : > { %p610_p1 = pneg %p1014_p12  ;;  %s232_s25 = sshll.u32 %s224_s22, 4  ;;  %s233_s25 = int_to_ptr.vmem [resolvable:$true] %s232_s25 }
  0x3c   : > { %p714_p10 = scmp.ne.s32.totalorder %s1026_s21, %s713_s9  ;;  %s718_s20 = scalar_lea.hbm %s1161_s2, 48 }
  0x3d   : > { %p1032_p13 = pnand %p610_p1, %p1165_p0  ;;  %p719_p4 = scmp.lt.u32.totalorder %s1026_s21, %s1161_s2 }
  0x3e   : > { %p716_p2 = pnand %p714_p10, %p685_p8  ;;  %p720_p11 = scmp.lt.u32.totalorder %s718_s20, %s713_s9 }
  0x3f   : > { %s1178_s30 = scalar_select %p1032_p13, 1, 0 }
  0x40   : > { %p717_p3 = pneg %p716_p2  ;;  %p721_p1 = por %p720_p11, %p719_p4 }
  0x41   : > { %p722_p0 = scmp.lt.u32.totalorder %s713_s9, %s1026_s21 }
  0x43   : > { %p723_p9 = por %p722_p0, %p721_p1 }
  0x45   : > { %p724_p7 = pnand %p723_p9, %p717_p3 }
  0x47   : > { %727 = shalt.err (!%p724_p7)
}
  0x48   : > { %s728_s23 = scalar_lea.vmem %s233_s25, 16  ;;  %s863_s22 = smov [#allocation8]  }
  0x49   : > { %p729_p5 = scmp.ne.s32.totalorder %s233_s25, %s728_s23  ;;  %s733_s11 = sshll.u32 %s863_s22, 4  ;;  %s734_s11 = int_to_ptr.vmem [resolvable:$false] %s733_s11 }
  0x4a   : > { %s735_s19 = scalar_lea.vmem %s734_s11, 32  ;;  %p736_p12 = scmp.lt.s32.totalorder %s233_s25, %s734_s11 }
  0x4b   : > { %p731_p10 = pnand %p729_p5, %p685_p8  ;;  %p737_p13 = scmp.lt.s32.totalorder %s735_s19, %s728_s23 }
  0x4d   : > { %p732_p2 = pneg %p731_p10  ;;  %p738_p4 = por %p737_p13, %p736_p12 }
  0x4f   : > { %p739_p11 = pnand %p738_p4, %p732_p2 }
  0x51   : > { %742 = shalt.err (!%p739_p11)
}
  0x52   : > { %620 = dma.hbm_to_vmem [thread:$0]  (!%p952_p6), %s1026_s21, 16, %s233_s25, %s956_s6  }
  0x53   : > { %s743_s9 = scalar_lea.hbm %s1159_s0, 256  ;;  %p1179_p0 = scmp.ne.s32.totalorder %s1178_s30, 0 }
  0x54   : > { %p744_p8 = scmp.ne.s32.totalorder %s1159_s0, %s743_s9  ;;  %p750_p12 = scmp.lt.u32.totalorder %s743_s9, %s1159_s0 }
  0x55   : > { %p745_p5 = pneg %p1179_p0 }
  0x57   : > { %p746_p7 = pnand %p745_p5, %p744_p8 }
  0x59   : > { %p747_p9 = pneg %p746_p7 }
  0x5b   : > { %p752_p13 = pnand %p750_p12, %p747_p9 }
  0x5d   : > { %755 = shalt.err (!%p752_p13)
}
  0x5e   : > { %s756_s5 = scalar_lea.vmem %s1018_s10, 256  ;;  %p764_p10 = scmp.lt.s32.totalorder %s1018_s10, %s1018_s10 }
  0x5f   : > { %p757_p6 = scmp.ne.s32.totalorder %s1018_s10, %s756_s5  ;;  %p765_p2 = scmp.lt.s32.totalorder %s756_s5, %s756_s5 }
  0x61   : > { %p759_p3 = pnand %p757_p6, %p745_p5  ;;  %p766_p4 = por %p765_p2, %p764_p10 }
  0x63   : > { %p760_p1 = pneg %p759_p3 }
  0x65   : > { %p767_p11 = pnand %p766_p4, %p760_p1 }
  0x67   : > { %770 = shalt.err (!%p767_p11)
}
  0x68   : > { %s1180_s1 = smov 8   ;;  %s1181_s6 = smov 128  }
  0x69   : > { %613 = dma.hbm_to_vmem [thread:$0]  (!%p1179_p0), %s1159_s0, 256, %s1018_s10, [#allocation4], %s1181_s6, %s1181_s6, %s1180_s1  }
  0x6a   : > { %p1182_p8 = scmp.ne.s32.totalorder %s1177_s8, 0 }
  0x6b   : > { %p1183_p5 = scmp.eq.s32.totalorder (!%p1182_p8), %s988_s28, 0 }
  0x6c   : > { %241 = sbr.rel (%p1182_p8) target bundleno = 372 (0x174), region = 32 }
  0x73   : > { %824 = dma.done.wait (%p1183_p5), [#allocation4], 256   ;;  %p1184_p7 = pmov %p1183_p5 }
  0x74   : > { %s247_s30 = sand.u32 1, %s988_s28   ;;  %s1088_s11 = sand.u32 1, %s841_s13  }
  0x75   : > { %826 = vsyncadd (%p1184_p7), [#allocation4], 4294967040  ;;  %s563_s19 = sshll.u32 %s1088_s11, 5  ;;  %s248_s26 = scalar_lea.sflag [#allocation7], %s247_s30 }
  0x76   : > { %s251_s27 = scalar_lea.vmem [#allocation6], %s563_s19  ;;  %p1185_p0 = scmp.ne.s32.totalorder %s1174_s7, 0 }
  0x78   : > { %828 = dma.done.wait (%p1185_p0), %s248_s26, 528  }
  0x79   : > { %830 = vsyncadd (%p1185_p0), %s248_s26, 4294966768  ;;  %vm293_vm0 = vcmask 261120   ;;  %v864_v0 = vmov 0.0   ;;  %v300_v1 = vld [vmem:[%s251_s27] sm:$0xff]  ;;  %v301_v2 = vld [vmem:[%s251_s27 + $0x8] sm:$0xff]  ;;  %s564_s28 = sshll.u32 %s1088_s11, 4 }
  0x7a   : > { %295 = vst.msk [vmem:[#allocation2 + $0x8] sm:$0xff] %vm293_vm0, %v864_v0  ;;  %294 = vst.msk [vmem:[#allocation2] sm:$0xff] %vm293_vm0, %v864_v0  ;;  %v302_v3 = vld [vmem:[%s251_s27 + $0x10] sm:$0xff]  ;;  %v592_v4 = vpack.c.bf16 %v301_v2, %v300_v1  ;;  %v303_v5 = vld [vmem:[%s251_s27 + $0x18] sm:$0xff]  ;;  %s259_s7 = scalar_lea.vmem [#allocation8], %s1088_s11  ;;  %s574_s8 = sshll.u32 %s849_s15, 8 }
  0x7b   : > { %v298_v6 = vld [vmem:[#allocation3] sm:$0xff]  ;;  %v596_v7 = vpack.c.bf16 %v303_v5, %v302_v3  ;;  %v299_v8 = vld [vmem:[#allocation3 + $0x8] sm:$0xff]  ;;  %v567_v15 = vld [vmem:[%s259_s7] ss:$0 sm:$0xff]  ;;  %s285_s10 = scalar_lea.vmem [#allocation9], %s564_s28  ;;  %s1107_s22 = scalar_lea.hbm %s1162_s3, %s574_s8 }
  0x7c   : > { %589 = vmatprep.mubr.msk.f32.mxu0 %vm293_vm0, %v298_v6  ;;  %593 = vmatprep.subr.bf16.mxu0 %v592_v4  ;;  %s423_s9 = sshll.u32 %s285_s10, 4  ;;  %s407_s15 = scalar_lea.sflag [#allocation5], %s1088_s11  ;;  %s1109_s9 = int_to_ptr.vmem [resolvable:$true] %s423_s9 }
  0x7d   : > { %595 = vmatpush3.bf16.msra.mxu0 %v592_v4  ;;  %s771_s5 = scalar_lea.vmem %s1109_s9, 256  ;;  %p1186_p12 = scmp.ne.s32.totalorder %s1175_s29, 0 }
  0x7e   : > { %597 = vmatprep.subr.bf16.mxu0 %v596_v7  ;;  %p772_p9 = scmp.ne.s32.totalorder %s1109_s9, %s771_s5  ;;  %s865_s1 = smov [#allocation9]  }
  0x7f   : > { %s775_s6 = sshll.u32 %s865_s1, 4  ;;  %s776_s6 = int_to_ptr.vmem [resolvable:$false] %s775_s6 }
  0x80   : > { %p773_p13 = pnand %p772_p9, %p1186_p12  ;;  %s777_s21 = scalar_lea.vmem %s776_s6, 512 }
  0x81   : > { %599 = vmatpush3.bf16.msra.mxu0 %v596_v7  ;;  %v297_v9 = vld [vmem:[#allocation2 + $0x8] sm:$0xff]  ;;  %v296_v10 = vld [vmem:[#allocation2] sm:$0xff]  ;;  %p778_p3 = scmp.lt.s32.totalorder %s1109_s9, %s776_s6  ;;  %p779_p1 = scmp.lt.s32.totalorder %s777_s21, %s771_s5 }
  0x82   : > { %p774_p6 = pneg %p773_p13 }
  0x83   : > { %p780_p10 = por %p779_p1, %p778_p3 }
  0x84   : > { %590 = vmatmul.mubr.msk.f32.vlgmr.msra.gmra.mrb[0].mxu0 %vm293_vm0, %v299_v8 }
  0x85   : > { %p781_p2 = pnand %p780_p10, %p774_p6 }
 0x157   : > { %v591_v11 = vpop.f32.mrb[0].mxu0 }
 0x158   : > { %v387_v12 = vadd.f32 %v591_v11, %v297_v9  ;;  %v377_v13 = vpop.f32.mrb[1].mxu0 }
 0x159   : > { %v386_v14 = vadd.f32 %v377_v13, %v296_v10 }
 0x15a   : > { %389 = vst.msk [vmem:[#allocation2 + $0x8] sm:$0xff] %vm293_vm0, %v387_v12 }
 0x15b   : > { %388 = vst.msk [vmem:[#allocation2] sm:$0xff] %vm293_vm0, %v386_v14 }
 0x161   : > { %v394_v16 = vld [vmem:[#allocation2 + $0x8] sm:$0xff] }
 0x162   : > { %v393_v17 = vld [vmem:[#allocation2] sm:$0xff]  ;;  %v403_v18 = vadd.f32 %v567_v15, %v394_v16 }
 0x163   : > { %v402_v19 = vadd.f32 %v567_v15, %v393_v17 }
 0x164   : > { %405 = vst.msk [vmem:[%s285_s10 + $0x8] sm:$0xff] %vm293_vm0, %v403_v18 }
 0x165   : > { %404 = vst.msk [vmem:[%s285_s10] sm:$0xff] %vm293_vm0, %v402_v19 }
 0x166   : > { %784 = shalt.err (!%p781_p2)
}
 0x167   : > { %s785_s25 = scalar_lea.hbm %s1107_s22, 256  ;;  %s789_s26 = scalar_lea.hbm %s1162_s3, 768 }
 0x168   : > { %p786_p4 = scmp.ne.s32.totalorder %s1107_s22, %s785_s25  ;;  %p790_p5 = scmp.lt.u32.totalorder %s1107_s22, %s1162_s3 }
 0x169   : > { %p791_p7 = scmp.lt.u32.totalorder %s789_s26, %s785_s25  ;;  %p793_p9 = scmp.lt.u32.totalorder %s785_s25, %s1107_s22 }
 0x16a   : > { %p787_p11 = pnand %p786_p4, %p1186_p12 }
 0x16b   : > { %p792_p0 = por %p791_p7, %p790_p5 }
 0x16c   : > { %p788_p8 = pneg %p787_p11 }
 0x16d   : > { %p794_p13 = por %p793_p9, %p792_p0 }
 0x16f   : > { %p795_p6 = pnand %p794_p13, %p788_p8 }
 0x171   : > { %798 = shalt.err (!%p795_p6)
}
 0x172   : > { %s866_s7 = smov 128   ;;  %s867_s8 = smov 8  }
 0x173   : > { %608 = dma.vmem_to_hbm [thread:$0]  (%p1186_p12), %s1109_s9, 256, %s1107_s22, %s407_s15, %s866_s7, %s866_s7, %s867_s8  }
 0x174 PF: > { %p628_p3 = scmp.ge.s32.totalorder %s857_s17, 2  ;;  %s438_s10 = sand.u32 1, %s837_s12  }
 0x175   : > { %p1187_p1 = scmp.ne.s32.totalorder %s1176_s4, 0  ;;  %s439_s20 = scalar_lea.sflag [#allocation5], %s438_s10 }
 0x177   : > { %p622_p10 = pnand %p628_p3, %p1187_p1 }
 0x179   : > { %832 = dma.done.wait (!%p622_p10), %s439_s20, 256  }
 0x17a   : > { %834 = vsyncadd (!%p622_p10), %s439_s20, 4294967040  ;;  %s20_s17 = sadd.s32 1, %s857_s17   ;;  %s1188_s12 = smov %s841_s13 }
 0x17b   : > { %p17_p2 = scmp.ge.s32.totalorder %s20_s17, 5   ;;  %s1189_s13 = smov %s845_s14 }
 0x17c   : > { %s1190_s14 = smov %s938_s24  ;;  %s1191_s15 = smov %s853_s16 }
 0x17d   : > { %s1192_s16 = smov %s1194_s18  ;;  %19 = sbr.rel (!%p17_p2) target bundleno = 9 (0x9), region = 102 }
 0x184   :  { %444 = vsyncpa [#allocation4], 1 }
 0x185   :  { %446 = vsyncpa [#allocation4 + $0x1], 1 }
 0x186   :  { %447 = vsyncpa [#allocation7], 1 }
 0x187   :  { %449 = vsyncpa [#allocation7 + $0x1], 1 }
 0x188   :  { %450 = vsyncpa [#allocation5], 1 }
 0x189   :  { %452 = vsyncpa [#allocation5 + $0x1], 1 }

</bundles_post_ra>
